<compile_context>
chip_gen: v6e
topology: v6e:2x2x1
jax: 0.10.0
libtpu: 0.0.40
codegen_flags: <defaults>
</compile_context>

<pallas_src>
import jax
import jax.numpy as jnp
from jax.experimental import pallas as pl
from jax.experimental.pallas import tpu as pltpu

_LANES = 128                    # vreg lane width (last dim of fallback layout)
_FUSED_THRESHOLD = 1 << 17      # below ~128K elements, prefer the fused jnp path
_SPLIT_BYTES = 2 * 1024 * 1024  # split a single big block in two above this


def _znet_kernel(theta_ref, x_ref, o_ref):
    # theta_ref: SMEM scalar (shape (1,)); x_ref / o_ref: lane-dense VMEM tiles.
    c = 2.0 * theta_ref[0]          # scalar ALU, once per grid step
    o_ref[...] = c * x_ref[...]     # pure VPU elementwise, full-width stores


_TPU_VMEM_CAP = None


def _vmem_capacity_bytes():
    """Trace-time VMEM capacity query; conservative (v7x-sized) fallback."""
    global _TPU_VMEM_CAP
    if _TPU_VMEM_CAP is None:
        cap = None
        try:
            cap = getattr(pltpu.get_tpu_info(), "vmem_capacity_bytes", None)
        except Exception:
            cap = None
        _TPU_VMEM_CAP = int(cap) if cap else 64 * 1024 * 1024
    return _TPU_VMEM_CAP


def _tile_budget():
    """(tile_bytes, vmem_limit_bytes) per TPU generation."""
    if _vmem_capacity_bytes() >= 100 * 1024 * 1024:
        # v5e / v6e: 128 MiB VMEM -> 8 MiB tiles, 64 MiB scoped limit.
        return 8 * 1024 * 1024, 64 * 1024 * 1024
    # v7x: 64 MiB VMEM per TC -> 4 MiB tiles, 40 MiB scoped limit (headroom
    # left for compiler-internal scratch).
    return 4 * 1024 * 1024, 40 * 1024 * 1024


def _choose_block_rows(rows, bytes_per_row, tile_bytes):
    """Pick an (8,128)-legal row-block size; keep grid >= 2 for big arrays."""
    target = max(1, tile_bytes // max(bytes_per_row, 1))
    if rows <= target:
        if rows >= 16 and rows * bytes_per_row >= _SPLIT_BYTES:
            # Worth splitting in two so a dual-TC part (v7x) can shard the
            # 'parallel' axis; block must be a multiple of 8 when not full.
            half = pl.cdiv(rows, 2)
            return ((half + 7) // 8) * 8
        return rows  # single full-extent block — always layout-legal
    return max(8, (target // 8) * 8)


def _run_pallas_2d(x2d, theta, tile_bytes, vmem_limit):
    """Scale a 2D array with lane-dense blocks; ragged last block is masked."""
    rows, n = x2d.shape
    bytes_per_row = n * x2d.dtype.itemsize
    block_rows = _choose_block_rows(rows, bytes_per_row, tile_bytes)
    grid = (pl.cdiv(rows, block_rows),)
    return pl.pallas_call(
        _znet_kernel,
        out_shape=jax.ShapeDtypeStruct((rows, n), x2d.dtype),
        grid=grid,
        in_specs=[
            pl.BlockSpec(memory_space=pltpu.MemorySpace.SMEM),    # theta scalar
            pl.BlockSpec((block_rows, n), lambda i: (i, 0)),      # x tile
        ],
        out_specs=pl.BlockSpec((block_rows, n), lambda i: (i, 0)),
        compiler_params=pltpu.CompilerParams(
            # "parallel" lets v7x shard the row axis across its 2 TensorCores;
            # harmless no-op on single-core v5e/v6e.
            dimension_semantics=("parallel",),
            vmem_limit_bytes=vmem_limit,
        ),
    )(theta, x2d)


def _run_pallas_flat(x, theta, tile_bytes, vmem_limit):
    """Fallback for awkward trailing dims: (rows, 128) lane-dense re-layout.

    Only the sub-128 remainder of the last row is padded (< 128 elements).
    """
    total = x.size
    rows = pl.cdiv(total, _LANES)
    padded = rows * _LANES
    x_flat = x.reshape(-1)
    if padded != total:
        x_flat = jnp.pad(x_flat, (0, padded - total))
    out2d = _run_pallas_2d(x_flat.reshape(rows, _LANES), theta,
                           tile_bytes, vmem_limit)
    out_flat = out2d.reshape(-1)
    if padded != total:
        out_flat = out_flat[:total]
    return out_flat.reshape(x.shape)


def model1_forward_fused(t, x, theta):
    """Pure-jnp path: preferable for small shapes / inside larger graphs."""
    del t
    return 2.0 * theta[0] * x


def model1_forward(t, x, theta, use_pallas=None):
    """Pallas equivalent of Model1.forward(t, x) = 2 * theta * x.

    Args:
      t:     (..., 1)  float32   -- unused (matches the PyTorch forward)
      x:     (..., n)  float32
      theta: (1,)      float32   -- ZNet parameter
      use_pallas: None = auto (size-based), True/False = force path.
    Returns:
      same shape/dtype as x.
    """
    del t  # unused, as in the reference module
    if use_pallas is None:
        use_pallas = x.size >= _FUSED_THRESHOLD
    if not use_pallas or x.size == 0:
        return model1_forward_fused(None, x, theta)

    tile_bytes, vmem_limit = _tile_budget()
    n = x.shape[-1] if x.ndim >= 1 else 1
    if x.ndim >= 2 and n % _LANES == 0 and n * x.dtype.itemsize <= tile_bytes:
        # Lane-aligned trailing dim: tile the (collapsed-leading-dims, n)
        # array directly — no ravel/pad/slice plumbing.
        x2d = x.reshape(-1, n)
        out2d = _run_pallas_2d(x2d, theta, tile_bytes, vmem_limit)
        return out2d.reshape(x.shape)
    return _run_pallas_flat(x, theta, tile_bytes, vmem_limit)


if __name__ == "__main__":
    key = jax.random.PRNGKey(0)
    k_t, k1, k2, k3 = jax.random.split(key, 4)

    # Deterministic parameter init, matching the module's __init__:
    #   ZNet.theta = -1.0,  Model1.y0 = 1.0 (y0 is unused in forward)
    theta = jnp.array([-1.0], dtype=jnp.float32)
    y0 = jnp.array([1.0], dtype=jnp.float32)  # unused in forward, kept for parity

    # 1) Small module-consistent demo (batch=8, n=32): force the Pallas path
    #    (auto-dispatch would pick the fused jnp path at this size).
    t = jax.random.uniform(k_t, (8, 1), dtype=jnp.float32)
    x = jax.random.normal(k1, (8, 32), dtype=jnp.float32)
    out = jax.block_until_ready(model1_forward(t, x, theta, use_pallas=True))
    assert out.shape == x.shape
    assert jnp.allclose(out, 2.0 * theta[0] * x, atol=1e-6, rtol=1e-6)

    # Auto-dispatch (fused path at this size) must agree.
    out_auto = jax.block_until_ready(model1_forward(t, x, theta))
    assert jnp.allclose(out_auto, out, atol=1e-6, rtol=1e-6)

    # 2) Lane-aligned trailing dim: direct 2D tiling, multi-block grid with a
    #    ragged (masked-write) last block, no pad/slice.
    x2 = jax.random.normal(k2, (2500, 384), dtype=jnp.float32)
    t2 = jnp.zeros((2500, 1), dtype=jnp.float32)
    out2 = jax.block_until_ready(model1_forward(t2, x2, theta))
    assert out2.shape == x2.shape
    assert jnp.allclose(out2, 2.0 * theta[0] * x2, atol=1e-6, rtol=1e-6)

    # 3) Awkward trailing dim / total: (rows, 128) lane-dense fallback with
    #    only a sub-128-element pad.
    x3 = jax.random.normal(k3, (7, 5, 13), dtype=jnp.float32)
    t3 = jnp.zeros((7, 5, 1), dtype=jnp.float32)
    out3 = jax.block_until_ready(model1_forward(t3, x3, theta, use_pallas=True))
    assert out3.shape == x3.shape
    assert jnp.allclose(out3, 2.0 * theta[0] * x3, atol=1e-6, rtol=1e-6)

    print("KERNEL_OK")
</pallas_src>

<mosaic_0001>
module attributes {stable_mosaic.version = 11 : i64} {
  func.func @_znet_kernel(%arg0: i32, %arg1: memref<1xf32, #tpu.memory_space<smem>>, %arg2: memref<2x128xf32, #tpu.memory_space<vmem>>, %arg3: memref<2x128xf32, #tpu.memory_space<vmem>>) attributes {dimension_semantics = [#tpu.dimension_semantics<parallel>], iteration_bounds = array<i64: 1>, scalar_prefetch = 0 : i64, scratch_operands = 0 : i64, tpu.core_type = #tpu.core_type<tc>, window_params = [{transform_indices = @transform_0, window_bounds = array<i64: 1>}, {transform_indices = @transform_1, window_bounds = array<i64: 2, 128>}, {transform_indices = @transform_2, window_bounds = array<i64: 2, 128>}]} {
    %c0 = arith.constant 0 : index
    %0 = memref.load %arg1[%c0] : memref<1xf32, #tpu.memory_space<smem>>
    %cst = arith.constant 2.000000e+00 : f32
    %1 = arith.mulf %cst, %0 : f32
    %c0_0 = arith.constant 0 : index
    %c0_1 = arith.constant 0 : index
    %2 = vector.load %arg2[%c0_0, %c0_1] : memref<2x128xf32, #tpu.memory_space<vmem>>, vector<2x128xf32>
    %3 = vector.broadcast %1 : f32 to vector<2x128xf32>
    %4 = arith.mulf %3, %2 : vector<2x128xf32>
    %c0_2 = arith.constant 0 : index
    %c0_3 = arith.constant 0 : index
    %5 = vector.load %arg3[%c0_2, %c0_3] : memref<2x128xf32, #tpu.memory_space<vmem>>, vector<2x128xf32>
    tpu.vector_store %arg3[%c0_2, %c0_3], %4 {strides = array<i32>} : memref<2x128xf32, #tpu.memory_space<vmem>>, vector<2x128xf32>,
    return
  }
  func.func @transform_0(%arg0: i32) -> i32 {
    %c0_i32 = arith.constant 0 : i32
    %c0_i32_0 = arith.constant 0 : i32
    return %c0_i32 : i32
  }
  func.func @transform_1(%arg0: i32) -> (i32, i32) {
    %c0_i32 = arith.constant 0 : i32
    %c0_i32_0 = arith.constant 0 : i32
    return %arg0, %c0_i32 : i32, i32
  }
  func.func @transform_2(%arg0: i32) -> (i32, i32) {
    %c0_i32 = arith.constant 0 : i32
    %c0_i32_0 = arith.constant 0 : i32
    return %arg0, %c0_i32 : i32, i32
  }
}

</mosaic_0001>

<bundles_post_ra>
// kernel: tpu_custom_call.1
= control target key start
LH: loop header
LB: loop body
LE: loop exit
PB: predicated region body
PF: predicated region fallthrough
CT: control target
= control target key end

     0   :  { %s81_s0 = inlined_call_operand.<no memory space> [shape: f32[1], index: 0, kind: input, shape index: {}]   ;;  %s82_s1 = inlined_call_operand.vmem [shape: f32[2,128], index: 1, kind: input, shape index: {}]   ;;  %s83_s2 = inlined_call_operand.hbm [shape: f32[2,128], index: 2, kind: output, shape index: {}]  }
   0x1   :  { %s14_s11 = smul.f32 2.0, %s81_s0  ;;  %v15_v0 = vld [vmem:[%s82_s1] sm:$0x3] }
   0x2   :  { %8 = vsyncpa [#allocation4], 0  ;;  %s56_s14 = smov [#allocation3]  }
   0x3   :  { %s25_s15 = sshll.u32 %s56_s14, 4  ;;  %v16_v1 = vstv %s14_s11  ;;  %s26_s15 = int_to_ptr.vmem [resolvable:$true] %s25_s15 }
   0x4   :  { %v17_v2 = vmul.f32 %v16_v1, %v15_v0  ;;  %s34_s16 = scalar_lea.vmem %s26_s15, 32  ;;  %p39_p1 = scmp.lt.s32.totalorder %s26_s15, %s26_s15 }
   0x5   :  { %p35_p0 = scmp.ne.s32.totalorder %s26_s15, %s34_s16  ;;  %p40_p2 = scmp.lt.s32.totalorder %s34_s16, %s34_s16 }
   0x6   :  { %18 = vst [vmem:[#allocation3] sm:$0x3] %v17_v2 }
   0x7   :  { %p41_p3 = por %p40_p2, %p39_p1 }
   0x9   :  { %p42_p4 = pnand %p41_p3, %p35_p0 }
   0xb   :  { %45 = shalt.err (!%p42_p4)
}
   0xc   :  { %28 = dma.vmem_to_hbm [thread:$0]  %s26_s15, 32, %s83_s2, [#allocation4]  }
   0xd   :  { %54 = dma.done.wait [#allocation4], 32  }
   0xe   :  { %55 = vsyncadd [#allocation4], 4294967264 }
   0xf   :  { %32 = vsyncpa [#allocation4], 1 }

</bundles_post_ra>
